<compile_context>
chip_gen: v6e
topology: v6e:2x2x1
jax: 0.10.0
libtpu: 0.0.40
codegen_flags: <defaults>
</compile_context>

<pallas_src>
import functools

import jax
import jax.numpy as jnp
from jax import lax
from jax.experimental import pallas as pl
from jax.experimental.pallas import tpu as pltpu

VAR_EPS = 1e-5


def _csn_kernel(x_ref, gamma_ref, beta_ref, o_ref, *, inv_hw, inv_hwm1,
                activation_fn):
    # x_ref: (R_TILE, HW) block; each row is an independent (n, c) instance.
    x = x_ref[...].astype(jnp.float32)                        # (R_TILE, HW)

    # Per-row mean / unbiased variance (torch.var default: correction=1).
    mean = jnp.sum(x, axis=-1, keepdims=True) * jnp.float32(inv_hw)
    diff = x - mean
    var = jnp.sum(diff * diff, axis=-1, keepdims=True) * jnp.float32(inv_hwm1)
    inv = lax.rsqrt(var + jnp.float32(VAR_EPS))               # (R_TILE, 1)

    gamma = gamma_ref[...].astype(jnp.float32)                # (R_TILE, 1)
    beta = beta_ref[...].astype(jnp.float32)                  # (R_TILE, 1)
    inv = inv * gamma

    # torch: data1 = inv.to(x.dtype) -> quantize the scale to the input dtype
    # before the multiply.  Skip the round-trip on the common f32 path.
    if jnp.dtype(x_ref.dtype) == jnp.dtype(jnp.float32):
        scale = inv
    else:
        scale = inv.astype(x_ref.dtype).astype(jnp.float32)
    shift = beta - mean * inv                                 # (R_TILE, 1)

    # Hot elementwise tail: one FMA per element, activation fused in f32.
    out = x * scale + shift
    if activation_fn is not None:
        out = activation_fn(out)
    o_ref[...] = out.astype(o_ref.dtype)


def _pick_row_tile(R, HW, itemsize, target_bytes=2 * 1024 * 1024):
    """Largest row tile that (a) divides R, (b) is a multiple of 8 (or the full
    extent when R % 8 != 0), and (c) keeps one x-block under `target_bytes` so
    double-buffered in+out stays inside every generation's scoped VMEM."""
    if R % 8 != 0:
        return R                       # small/odd R: full extent is always legal
    best = 8                           # minimum sublane-aligned tile
    for cand in range(8, R + 1, 8):
        if R % cand == 0 and cand * HW * itemsize <= target_bytes:
            best = max(best, cand)
    return best


def conditional_style_norm(x_nchw, style_params, order, activation_fn=None):
    """x_nchw: (N, C, H, W). style_params: dict whose values are
    [beta_0, gamma_0, beta_1, gamma_1, ...] each of shape (1, C, 1, 1)."""
    N, C, H, W = x_nchw.shape
    HW = H * W
    R = N * C

    # get_style_parameters: iterate dict values in insertion order.
    sp = [style_params[k] for k in style_params.keys()]
    beta = sp[order * 2]
    gamma = sp[order * 2 + 1]

    # Flatten to independent rows; broadcast the per-channel style params to a
    # per-row (R, 1) vector (tiny: N*C floats).
    x2 = x_nchw.reshape(R, HW)
    gamma2 = jnp.broadcast_to(gamma.reshape(1, C), (N, C)).reshape(R, 1)
    beta2 = jnp.broadcast_to(beta.reshape(1, C), (N, C)).reshape(R, 1)

    itemsize = jnp.dtype(x2.dtype).itemsize
    r_tile = _pick_row_tile(R, HW, itemsize)
    num_r = R // r_tile
    block_bytes = r_tile * HW * itemsize

    # TODO(synk): for very large H*W (one 8-row f32 block >> 8 MiB) an HW-tiled
    # two-pass sum / sum-of-squares accumulation over an inner "arbitrary" grid
    # axis would bound VMEM further (v7x has only 64 MiB physical); not needed
    # for typical image resolutions.
    vmem_limit = int(max(32 << 20, min(4 * block_bytes + (4 << 20), 64 << 20)))

    kernel = functools.partial(
        _csn_kernel,
        inv_hw=float(1.0 / HW),
        inv_hwm1=float(1.0 / (HW - 1)) if HW > 1 else float("nan"),
        activation_fn=activation_fn)

    cost = pl.CostEstimate(
        flops=8 * R * HW,
        transcendentals=R,
        bytes_accessed=2 * R * HW * itemsize + 2 * R * 4,
    )

    out = pl.pallas_call(
        kernel,
        out_shape=jax.ShapeDtypeStruct((R, HW), x2.dtype),
        grid_spec=pltpu.PrefetchScalarGridSpec(
            num_scalar_prefetch=0,
            grid=(num_r,),
            in_specs=[
                pl.BlockSpec((r_tile, HW), lambda r: (r, 0)),
                pl.BlockSpec((r_tile, 1), lambda r: (r, 0)),
                pl.BlockSpec((r_tile, 1), lambda r: (r, 0)),
            ],
            out_specs=pl.BlockSpec((r_tile, HW), lambda r: (r, 0)),
        ),
        compiler_params=pltpu.CompilerParams(
            dimension_semantics=("parallel",),
            vmem_limit_bytes=vmem_limit),
        cost_estimate=cost,
    )(x2, gamma2, beta2)

    return out.reshape(N, C, H, W)


def _reference(x, style_params, order, activation_fn=None):
    sp = [style_params[k] for k in style_params.keys()]
    beta = sp[order * 2]
    gamma = sp[order * 2 + 1]
    mean = jnp.mean(x, axis=(2, 3), keepdims=True)
    var = jnp.var(x, axis=(2, 3), keepdims=True, ddof=1)  # unbiased like torch
    inv = lax.rsqrt(var + VAR_EPS) * gamma
    out = x * inv.astype(x.dtype) + (beta - mean * inv)
    if activation_fn is not None:
        out = activation_fn(out)
    return out


if __name__ == "__main__":
    key = jax.random.PRNGKey(0)
    k1, k2, k3, k4, k5 = jax.random.split(key, 5)

    # --- check 1: module-default shapes, no activation, lane-dense HW.
    N, C, H, W = 2, 4, 16, 16
    x = jax.random.normal(k1, (N, C, H, W), dtype=jnp.float32)
    beta0 = 0.1 * jax.random.normal(k2, (1, C, 1, 1), dtype=jnp.float32)
    gamma0 = 1.0 + 0.1 * jax.random.normal(k3, (1, C, 1, 1), dtype=jnp.float32)
    style_params = {"beta_0": beta0, "gamma_0": gamma0}

    out = conditional_style_norm(x, style_params, 0, activation_fn=None)
    out = jax.block_until_ready(out)
    ref = _reference(x, style_params, 0)
    assert out.shape == (N, C, H, W)
    assert jnp.allclose(out, ref, atol=1e-4, rtol=1e-4), "mismatch (check 1)"

    # --- check 2: non-128-multiple spatial extent (ragged lanes, no pad/slice)
    #              plus fused activation.
    N2, C2, H2, W2 = 2, 8, 5, 5
    x2 = jax.random.normal(k4, (N2, C2, H2, W2), dtype=jnp.float32)
    beta1 = 0.1 * jax.random.normal(k2, (1, C2, 1, 1), dtype=jnp.float32)
    gamma1 = 1.0 + 0.1 * jax.random.normal(k3, (1, C2, 1, 1), dtype=jnp.float32)
    style_params2 = {"beta_0": beta1, "gamma_0": gamma1}

    out2 = conditional_style_norm(x2, style_params2, 0, activation_fn=jax.nn.relu)
    out2 = jax.block_until_ready(out2)
    ref2 = _reference(x2, style_params2, 0, activation_fn=jax.nn.relu)
    assert out2.shape == (N2, C2, H2, W2)
    assert jnp.allclose(out2, ref2, atol=1e-4, rtol=1e-4), "mismatch (check 2)"

    # --- check 3: odd channel count (N*C not a multiple of 8) exercises the
    #              full-extent row-tile fallback.
    N3, C3, H3, W3 = 1, 3, 9, 9
    x3 = jax.random.normal(k5, (N3, C3, H3, W3), dtype=jnp.float32)
    beta2_ = 0.1 * jax.random.normal(k2, (1, C3, 1, 1), dtype=jnp.float32)
    gamma2_ = 1.0 + 0.1 * jax.random.normal(k3, (1, C3, 1, 1), dtype=jnp.float32)
    style_params3 = {"beta_0": beta2_, "gamma_0": gamma2_}

    out3 = conditional_style_norm(x3, style_params3, 0, activation_fn=None)
    out3 = jax.block_until_ready(out3)
    ref3 = _reference(x3, style_params3, 0)
    assert out3.shape == (N3, C3, H3, W3)
    assert jnp.allclose(out3, ref3, atol=1e-4, rtol=1e-4), "mismatch (check 3)"

    print("KERNEL_OK")
</pallas_src>

<mosaic_0001>
module attributes {stable_mosaic.version = 11 : i64} {
  func.func @_csn_kernel(%arg0: i32, %arg1: memref<8x256xf32, #tpu.memory_space<vmem>>, %arg2: memref<8x1xf32, #tpu.memory_space<vmem>>, %arg3: memref<8x1xf32, #tpu.memory_space<vmem>>, %arg4: memref<8x256xf32, #tpu.memory_space<vmem>>) attributes {dimension_semantics = [#tpu.dimension_semantics<parallel>], iteration_bounds = array<i64: 1>, scalar_prefetch = 0 : i64, scratch_operands = 0 : i64, tpu.core_type = #tpu.core_type<tc>, window_params = [{transform_indices = @transform_0, window_bounds = array<i64: 8, 256>}, {transform_indices = @transform_1, window_bounds = array<i64: 8, 1>}, {transform_indices = @transform_2, window_bounds = array<i64: 8, 1>}, {transform_indices = @transform_3, window_bounds = array<i64: 8, 256>}]} {
    %c0 = arith.constant 0 : index
    %c0_0 = arith.constant 0 : index
    %0 = vector.load %arg1[%c0, %c0_0] : memref<8x256xf32, #tpu.memory_space<vmem>>, vector<8x256xf32>
    %cst = arith.constant dense<0.000000e+00> : vector<8xf32>
    %1 = vector.multi_reduction <add>, %0, %cst [1] : vector<8x256xf32> to vector<8xf32>
    %2 = vector.shape_cast %1 : vector<8xf32> to vector<8x1xf32>
    %cst_1 = arith.constant 3.906250e-03 : f32
    %3 = vector.broadcast %cst_1 : f32 to vector<8x1xf32>
    %4 = arith.mulf %2, %3 : vector<8x1xf32>
    %5 = vector.broadcast %4 : vector<8x1xf32> to vector<8x256xf32>
    %6 = arith.subf %0, %5 : vector<8x256xf32>
    %7 = arith.mulf %6, %6 : vector<8x256xf32>
    %cst_2 = arith.constant dense<0.000000e+00> : vector<8xf32>
    %8 = vector.multi_reduction <add>, %7, %cst_2 [1] : vector<8x256xf32> to vector<8xf32>
    %9 = vector.shape_cast %8 : vector<8xf32> to vector<8x1xf32>
    %cst_3 = arith.constant 0.00392156886 : f32
    %10 = vector.broadcast %cst_3 : f32 to vector<8x1xf32>
    %11 = arith.mulf %9, %10 : vector<8x1xf32>
    %cst_4 = arith.constant 9.99999974E-6 : f32
    %12 = vector.broadcast %cst_4 : f32 to vector<8x1xf32>
    %13 = arith.addf %11, %12 : vector<8x1xf32>
    %14 = math.rsqrt %13 : vector<8x1xf32>
    %c0_5 = arith.constant 0 : index
    %c0_6 = arith.constant 0 : index
    %15 = vector.load %arg2[%c0_5, %c0_6] : memref<8x1xf32, #tpu.memory_space<vmem>>, vector<8x1xf32>
    %c0_7 = arith.constant 0 : index
    %c0_8 = arith.constant 0 : index
    %16 = vector.load %arg3[%c0_7, %c0_8] : memref<8x1xf32, #tpu.memory_space<vmem>>, vector<8x1xf32>
    %17 = arith.mulf %14, %15 : vector<8x1xf32>
    %18 = arith.mulf %4, %17 : vector<8x1xf32>
    %19 = arith.subf %16, %18 : vector<8x1xf32>
    %20 = vector.broadcast %17 : vector<8x1xf32> to vector<8x256xf32>
    %21 = arith.mulf %0, %20 : vector<8x256xf32>
    %22 = vector.broadcast %19 : vector<8x1xf32> to vector<8x256xf32>
    %23 = arith.addf %21, %22 : vector<8x256xf32>
    %c0_9 = arith.constant 0 : index
    %c0_10 = arith.constant 0 : index
    %24 = vector.load %arg4[%c0_9, %c0_10] : memref<8x256xf32, #tpu.memory_space<vmem>>, vector<8x256xf32>
    tpu.vector_store %arg4[%c0_9, %c0_10], %23 {strides = array<i32>} : memref<8x256xf32, #tpu.memory_space<vmem>>, vector<8x256xf32>,
    return
  }
  func.func @transform_0(%arg0: i32) -> (i32, i32) {
    %c0_i32 = arith.constant 0 : i32
    %c0_i32_0 = arith.constant 0 : i32
    return %arg0, %c0_i32 : i32, i32
  }
  func.func @transform_1(%arg0: i32) -> (i32, i32) {
    %c0_i32 = arith.constant 0 : i32
    %c0_i32_0 = arith.constant 0 : i32
    return %arg0, %c0_i32 : i32, i32
  }
  func.func @transform_2(%arg0: i32) -> (i32, i32) {
    %c0_i32 = arith.constant 0 : i32
    %c0_i32_0 = arith.constant 0 : i32
    return %arg0, %c0_i32 : i32, i32
  }
  func.func @transform_3(%arg0: i32) -> (i32, i32) {
    %c0_i32 = arith.constant 0 : i32
    %c0_i32_0 = arith.constant 0 : i32
    return %arg0, %c0_i32 : i32, i32
  }
}

</mosaic_0001>

<bundles_post_ra>
// kernel: tpu_custom_call.1
= control target key start
LH: loop header
LB: loop body
LE: loop exit
PB: predicated region body
PF: predicated region fallthrough
CT: control target
= control target key end

     0   :  { %s131_s0 = inlined_call_operand.vmem [shape: f32[8,256], index: 0, kind: input, shape index: {}]   ;;  %s132_s1 = inlined_call_operand.vmem [shape: f32[8,1], index: 1, kind: input, shape index: {}]   ;;  %s133_s2 = inlined_call_operand.vmem [shape: f32[8,1], index: 2, kind: input, shape index: {}]   ;;  %s134_s3 = inlined_call_operand.hbm [shape: f32[8,256], index: 3, kind: output, shape index: {}]  }
   0x1   :  { %v15_v0 = vld [vmem:[%s131_s0] sm:$0xff]  ;;  %v16_v1 = vld [vmem:[%s131_s0 + $0x8] sm:$0xff] }
   0x2   :  { %8 = vsyncpa [#allocation3], 0  ;;  %v17_v2 = vadd.f32 %v16_v1, %v15_v0  ;;  %v94_v10 = vmov 0   ;;  %v31_v14 = vld [vmem:[%s132_s1] sm:$0xff]  ;;  %s95_s19 = smov [#allocation2]  }
   0x3   :  { %68 = vset.pattern.permute.xlu1 %v94_v10  ;;  %69 = vset.pattern.permute.xlu0 %v94_v10  ;;  %v32_v17 = vld [vmem:[%s133_s2] sm:$0xff]  ;;  %s58_s20 = sshll.u32 %s95_s19, 4  ;;  %s59_s20 = int_to_ptr.vmem [resolvable:$true] %s58_s20 }
   0x4   :  { %18 = vadd.xlane.f32.xlu0 %v17_v2  ;;  %s72_s1 = scalar_lea.vmem %s59_s20, 256  ;;  %p77_p1 = scmp.lt.s32.totalorder %s59_s20, %s59_s20 }
   0x5   :  { %p73_p0 = scmp.ne.s32.totalorder %s59_s20, %s72_s1  ;;  %p78_p2 = scmp.lt.s32.totalorder %s72_s1, %s72_s1 }
   0x7   :  { %p79_p3 = por %p78_p2, %p77_p1 }
   0x9   :  { %p80_p4 = pnand %p79_p3, %p73_p0 }
  0x8d   :  { %v19_v3 = vpop.xlane.xlu0 %18 }
  0x8e   :  { %v20_v4 = vmul.f32 0.00390625, %v19_v3 }
  0x90   :  { %v21_v5 = vsub.f32 %v15_v0, %v20_v4  ;;  %v22_v6 = vsub.f32 %v16_v1, %v20_v4 }
  0x92   :  { %v23_v7 = vmul.f32 %v21_v5, %v21_v5  ;;  %v24_v8 = vmul.f32 %v22_v6, %v22_v6 }
  0x94   :  { %v25_v9 = vadd.f32 %v24_v8, %v23_v7 }
  0x96   :  { %26 = vadd.xlane.f32.xlu0 %v25_v9 }
 0x11f   :  { %v27_v11 = vpop.xlane.xlu0 %26 }
 0x120   :  { %v28_v12 = vmul.f32 0.003921569, %v27_v11 }
 0x122   :  { %v29_v13 = vadd.f32 1e-05, %v28_v12 }
 0x124   :  { %70 = vrsqrt.f32 %v29_v13 }
 0x131   :  { %v71_v15 = vpop.eup %70 }
 0x132   :  { %v33_v16 = vmul.f32 %v71_v15, %v31_v14 }
 0x134   :  { %38 = vperm.xlu1 %68, %v33_v16   ;;  %v34_v18 = vmul.f32 %v33_v16, %v20_v4 }
 0x136   :  { %v35_v19 = vsub.f32 %v32_v17, %v34_v18 }
 0x138   :  { %45 = vperm.xlu1 %68, %v35_v19  }
 0x1af   :  { %v39_v20 = vpop.permute.xlu1 %38 }
 0x1b0   :  { %v41_v21 = vmul.f32 %v39_v20, %v15_v0  ;;  %v42_v22 = vmul.f32 %v39_v20, %v16_v1 }
 0x1b3   :  { %v46_v23 = vpop.permute.xlu1 %45 }
 0x1b4   :  { %v48_v24 = vadd.f32 %v46_v23, %v41_v21  ;;  %v49_v25 = vadd.f32 %v46_v23, %v42_v22 }
 0x1b6   :  { %50 = vst [vmem:[#allocation2] sm:$0xff] %v48_v24  ;;  %51 = vst [vmem:[#allocation2 + $0x8] sm:$0xff] %v49_v25 }
 0x1b7   :  { %83 = shalt.err (!%p80_p4)
}
 0x1b8   :  { %61 = dma.vmem_to_hbm [thread:$0]  %s59_s20, 256, %s134_s3, [#allocation3]  }
 0x1b9   :  { %92 = dma.done.wait [#allocation3], 256  }
 0x1ba   :  { %93 = vsyncadd [#allocation3], 4294967040 }
 0x1bb   :  { %65 = vsyncpa [#allocation3], 1 }

</bundles_post_ra>
